<compile_context>
chip_gen: v5e
topology: v5e:2x2
jax: 0.10.0
libtpu: 0.0.40
codegen_flags: <defaults>
</compile_context>

<pallas_src>
import jax
import jax.numpy as jnp
from jax.experimental import pallas as pl
from jax.experimental.pallas import tpu as pltpu


def _round_up(x, m):
    return ((x + m - 1) // m) * m


def clip_linear_kernel(x_ref, w_ref, o_ref):
    # x_ref: (tb, D)  block of unnormalized image features (bf16 or f32)
    # w_ref: (D, tc)  pre-transposed, class-padded, bf16 text-feature weight block
    # o_ref: (tb, tc) logits block
    x = x_ref[...].astype(jnp.float32)
    # 100 * x / ||x||  -- scale folded into the (tb, 1) inv-norm column.
    ss = jnp.sum(x * x, axis=-1, keepdims=True)
    inv_norm = 100.0 * jax.lax.rsqrt(jnp.maximum(ss, 1e-12))
    xn = (x * inv_norm).astype(w_ref.dtype)   # bf16 matmul operands
    o_ref[...] = jnp.dot(
        xn, w_ref[...], preferred_element_type=jnp.float32
    ).astype(o_ref.dtype)


def prepare_clip_weight(weight, *, compute_dtype=jnp.bfloat16):
    """One-time weight preparation (call at model init, NOT per forward).

    weight: (C, D) torch.nn.Linear.weight layout (row-normalized text features)
    returns: (D, C_pad) compute_dtype array, classes zero-padded to a multiple of 128
             so the kernel's output stores are lane-dense.
    """
    w = jnp.asarray(weight, jnp.float32)
    C, D = w.shape
    C_pad = _round_up(C, 128)
    w_dc = w.T                                  # (D, C): K-on-sublane / N-on-lane
    if C_pad != C:
        w_dc = jnp.pad(w_dc, ((0, 0), (0, C_pad - C)))
    return w_dc.astype(compute_dtype)


def clip_linear_forward(image_features, w_dc, num_classes, *, tb=512, tc=2048,
                        out_dtype=jnp.float32):
    """Fused L2-normalize + 100 * Linear (weight = normalized text features, no bias).

    image_features: (B, D)      unnormalized image features (f32 or bf16)
    w_dc:           (D, C_pad)  output of prepare_clip_weight (bf16, pre-transposed)
    num_classes:    C           true number of classes (<= C_pad)
    returns:        (B, C)      logits (out_dtype, default f32)
    """
    B, D = image_features.shape
    D2, C_pad = w_dc.shape
    assert D == D2 and num_classes <= C_pad

    # Batch tile: multiple of 8 (and of 256 in the large regime), no larger than needed.
    tb = min(tb, _round_up(B, 8))
    # Class tile: single tile (weight resident across the whole grid) whenever it fits;
    # C_pad is already a multiple of 128 so any tc <= C_pad here is lane-aligned.
    tc = min(tc, C_pad)

    # Feed the MXU/HBM in the weight's compute dtype (bf16): halves feature DMA bytes.
    x = image_features
    if x.dtype != w_dc.dtype:
        x = x.astype(w_dc.dtype)

    grid = (pl.cdiv(B, tb), pl.cdiv(C_pad, tc))

    out = pl.pallas_call(
        clip_linear_kernel,
        out_shape=jax.ShapeDtypeStruct((B, C_pad), out_dtype),
        grid_spec=pltpu.PrefetchScalarGridSpec(
            num_scalar_prefetch=0,
            grid=grid,
            in_specs=[
                pl.BlockSpec((tb, D), lambda i, j: (i, 0)),   # batch-tiled features
                pl.BlockSpec((D, tc), lambda i, j: (0, j)),   # class-tiled weight
            ],
            out_specs=pl.BlockSpec((tb, tc), lambda i, j: (i, j)),
        ),
        compiler_params=pltpu.CompilerParams(
            dimension_semantics=("parallel", "parallel"),
        ),
    )(x, w_dc)

    if C_pad != num_classes:
        out = out[:, :num_classes]
    return out


if __name__ == "__main__":
    key = jax.random.PRNGKey(0)
    k_txt, k_img = jax.random.split(key)

    # ViT-B-32 -> feature_dim = 512; small synthetic class count and batch.
    feature_dim = 512
    num_classes = 4    # len(tokens)
    batch = 8

    # Deterministic stand-in for the text-feature init of the linear weight:
    # row-wise L2-normalized (as in __init__: mean over templates then renorm).
    text_feats = jax.random.normal(k_txt, (num_classes, feature_dim), jnp.float32)
    text_feats = text_feats / jnp.linalg.norm(text_feats, axis=-1, keepdims=True)
    weight = text_feats  # nn.Linear.weight, shape (C, D), bias=False

    # Deterministic stand-in for encode_image output (unnormalized features).
    image_features = jax.random.normal(k_img, (batch, feature_dim), jnp.float32)

    # One-time weight prep (model init), then the hot-path forward.
    w_dc = prepare_clip_weight(weight)
    logits = clip_linear_forward(image_features, w_dc, num_classes)
    logits = jax.block_until_ready(logits)

    # Pure-JAX f32 reference of the module's forward (post-encoder part).
    xn_ref = image_features / jnp.linalg.norm(image_features, axis=-1, keepdims=True)
    logits_ref = 100.0 * (xn_ref @ weight.T)

    assert logits.shape == (batch, num_classes)
    # bf16 operands on the 100x-scaled logits: allow ~0.3 absolute error, and
    # require the classification decision (argmax) to match exactly.
    max_abs_err = float(jnp.max(jnp.abs(logits - logits_ref)))
    assert max_abs_err < 0.3, max_abs_err
    assert jnp.array_equal(jnp.argmax(logits, -1), jnp.argmax(logits_ref, -1))
    print("KERNEL_OK")
</pallas_src>

<mosaic_0001>
module attributes {stable_mosaic.version = 11 : i64} {
  func.func @clip_linear_kernel(%arg0: i32, %arg1: i32, %arg2: memref<8x512xbf16, #tpu.memory_space<vmem>>, %arg3: memref<512x128xbf16, #tpu.memory_space<vmem>>, %arg4: memref<8x128xf32, #tpu.memory_space<vmem>>) attributes {dimension_semantics = [#tpu.dimension_semantics<parallel>, #tpu.dimension_semantics<parallel>], iteration_bounds = array<i64: 1, 1>, scalar_prefetch = 0 : i64, scratch_operands = 0 : i64, tpu.core_type = #tpu.core_type<tc>, window_params = [{transform_indices = @transform_0, window_bounds = array<i64: 8, 512>}, {transform_indices = @transform_1, window_bounds = array<i64: 512, 128>}, {transform_indices = @transform_2, window_bounds = array<i64: 8, 128>}]} {
    %c0 = arith.constant 0 : index
    %c0_0 = arith.constant 0 : index
    %0 = vector.load %arg2[%c0, %c0_0] : memref<8x512xbf16, #tpu.memory_space<vmem>>, vector<8x512xbf16>
    %1 = arith.extf %0 : vector<8x512xbf16> to vector<8x512xf32>
    %2 = arith.mulf %1, %1 : vector<8x512xf32>
    %cst = arith.constant dense<0.000000e+00> : vector<8xf32>
    %3 = vector.multi_reduction <add>, %2, %cst [1] : vector<8x512xf32> to vector<8xf32>
    %4 = vector.shape_cast %3 : vector<8xf32> to vector<8x1xf32>
    %cst_1 = arith.constant 9.99999996E-13 : f32
    %5 = vector.broadcast %cst_1 : f32 to vector<8x1xf32>
    %6 = arith.maximumf %4, %5 : vector<8x1xf32>
    %7 = math.rsqrt %6 : vector<8x1xf32>
    %cst_2 = arith.constant 1.000000e+02 : f32
    %8 = vector.broadcast %cst_2 : f32 to vector<8x1xf32>
    %9 = arith.mulf %8, %7 : vector<8x1xf32>
    %10 = vector.broadcast %9 : vector<8x1xf32> to vector<8x512xf32>
    %11 = arith.mulf %1, %10 : vector<8x512xf32>
    %12 = arith.truncf %11 : vector<8x512xf32> to vector<8x512xbf16>
    %c0_3 = arith.constant 0 : index
    %c0_4 = arith.constant 0 : index
    %13 = vector.load %arg3[%c0_3, %c0_4] : memref<512x128xbf16, #tpu.memory_space<vmem>>, vector<512x128xbf16>
    %cst_5 = arith.constant dense<0.000000e+00> : vector<8x128xf32>
    %14 = tpu.matmul %12, %13, %cst_5 {dimension_numbers = #tpu.dot_dimension_numbers<[1], [0], [0], [1], [0, 0, 1, 1], [], []>} : vector<8x512xbf16>, vector<512x128xbf16>, vector<8x128xf32> -> vector<8x128xf32>
    %c0_6 = arith.constant 0 : index
    %c0_7 = arith.constant 0 : index
    %15 = vector.load %arg4[%c0_6, %c0_7] : memref<8x128xf32, #tpu.memory_space<vmem>>, vector<8x128xf32>
    tpu.vector_store %arg4[%c0_6, %c0_7], %14 {strides = array<i32>} : memref<8x128xf32, #tpu.memory_space<vmem>>, vector<8x128xf32>,
    return
  }
  func.func @transform_0(%arg0: i32, %arg1: i32) -> (i32, i32) {
    %c0_i32 = arith.constant 0 : i32
    %c0_i32_0 = arith.constant 0 : i32
    return %arg0, %c0_i32 : i32, i32
  }
  func.func @transform_1(%arg0: i32, %arg1: i32) -> (i32, i32) {
    %c0_i32 = arith.constant 0 : i32
    %c0_i32_0 = arith.constant 0 : i32
    return %c0_i32, %arg1 : i32, i32
  }
  func.func @transform_2(%arg0: i32, %arg1: i32) -> (i32, i32) {
    %c0_i32 = arith.constant 0 : i32
    return %arg0, %arg1 : i32, i32
  }
}

</mosaic_0001>

<bundles_post_ra>
// kernel: tpu_custom_call.1
= control target key start
LH: loop header
LB: loop body
LE: loop exit
PB: predicated region body
PF: predicated region fallthrough
CT: control target
= control target key end

     0   :  { %7 = vsyncpa [#allocation3], 0  ;;  %s698_s0 = inlined_call_operand.hbm [shape: bf16[8,512], index: 0, kind: input, shape index: {}]   ;;  %s699_s1 = inlined_call_operand.hbm [shape: bf16[512,128], index: 1, kind: input, shape index: {}]   ;;  %s700_s2 = inlined_call_operand.hbm [shape: f32[8,128], index: 2, kind: output, shape index: {}]  }
   0x1   :  { %8 = vsyncpa [#allocation6], 0 }
   0x2   :  { %9 = vsyncpa [#allocation4], 0  ;;  %s15_s11 = sshll.u32 %s698_s0, 4  ;;  %s649_s12 = smov [#allocation2]   ;;  %s16_s11 = int_to_ptr.hbm [resolvable:$true] %s15_s11 }
   0x3   :  { %s17_s13 = sshll.u32 %s649_s12, 4  ;;  %s25_s16 = sshll.u32 %s699_s1, 4  ;;  %s18_s13 = int_to_ptr.vmem [resolvable:$true] %s17_s13  ;;  %s26_s16 = int_to_ptr.hbm [resolvable:$true] %s25_s16 }
   0x4   :  { %20 = dma.hbm_to_vmem [thread:$0]  %s16_s11, 256, %s18_s13, [#allocation3]  }
   0x5   :  { %s650_s17 = smov [#allocation5]   ;;  %s651_s19 = smov 64  }
   0x6   :  { %s27_s18 = sshll.u32 %s650_s17, 4  ;;  %s652_s20 = smov 4   ;;  %s28_s18 = int_to_ptr.vmem [resolvable:$true] %s27_s18 }
   0x7   :  { %33 = dma.hbm_to_vmem [thread:$0]  %s26_s16, 4096, %s28_s18, [#allocation6], %s651_s19, %s651_s19, %s652_s20  }
   0x8   :  { %643 = dma.done.wait [#allocation3], 256  }
   0x9   :  { %644 = vsyncadd [#allocation3], 4294967040 }
   0xa   :  { %645 = dma.done.wait [#allocation6], 4096  }
   0xb   :  { %646 = vsyncadd [#allocation6], 4294963200  ;;  %v42_v0 = vld [vmem:[#allocation2] sm:$0xff]  ;;  %v43_v1 = vld [vmem:[#allocation2 + $0x8] sm:$0xff]  ;;  %s653_s0 = smov [#allocation7]   ;;  %s393_s23 = sshll.u32 %s700_s2, 4  ;;  %s394_s23 = int_to_ptr.hbm [resolvable:$true] %s393_s23 }
   0xc   :  { %v539_v2 = vld [vmem:[#allocation5 + $0x38] sm:$0xff]  ;;  %v675_v3 = vunpack.c.l.bf16 %v42_v0  ;;  %v677_v4 = vunpack.c.h.bf16 %v42_v0  ;;  %v679_v5 = vunpack.c.l.bf16 %v43_v1  ;;  %v681_v6 = vunpack.c.h.bf16 %v43_v1  ;;  %v538_v17 = vld [vmem:[#allocation5 + $0x30] sm:$0xff]  ;;  %v537_v21 = vld [vmem:[#allocation5 + $0x28] sm:$0xff]  ;;  %s391_s1 = sshll.u32 %s653_s0, 4  ;;  %s392_s1 = int_to_ptr.vmem [resolvable:$true] %s391_s1 }
   0xd   :  { %v547_v7 = vld [vmem:[#allocation5 + $0x78] sm:$0xff]  ;;  %333 = vmatpush.bf16.msra.mxu0 %v539_v2  ;;  %v546_v18 = vld [vmem:[#allocation5 + $0x70] sm:$0xff]  ;;  %v545_v22 = vld [vmem:[#allocation5 + $0x68] sm:$0xff] }
   0xe   :  { %v555_v8 = vld [vmem:[#allocation5 + $0xb8] sm:$0xff]  ;;  %v48_v10 = vmul.f32 %v675_v3, %v675_v3  ;;  %v49_v11 = vmul.f32 %v677_v4, %v677_v4  ;;  %v50_v12 = vmul.f32 %v679_v5, %v679_v5  ;;  %346 = vmatpush.bf16.msra.mxu1 %v547_v7  ;;  %v51_v13 = vmul.f32 %v681_v6, %v681_v6  ;;  %v554_v19 = vld [vmem:[#allocation5 + $0xb0] sm:$0xff]  ;;  %v553_v23 = vld [vmem:[#allocation5 + $0xa8] sm:$0xff] }
   0xf   :  { %v563_v9 = vld [vmem:[#allocation5 + $0xf8] sm:$0xff]  ;;  %359 = vmatpush.bf16.msra.mxu2 %v555_v8  ;;  %v562_v20 = vld [vmem:[#allocation5 + $0xf0] sm:$0xff]  ;;  %v561_v24 = vld [vmem:[#allocation5 + $0xe8] sm:$0xff] }
  0x10   :  { %372 = vmatpush.bf16.msra.mxu3 %v563_v9  ;;  %v52_v14 = vadd.f32 %v49_v11, %v48_v10  ;;  %v536_v25 = vld [vmem:[#allocation5 + $0x20] sm:$0xff]  ;;  %v535_v29 = vld [vmem:[#allocation5 + $0x18] sm:$0xff]  ;;  %v534_v33 = vld [vmem:[#allocation5 + $0x10] sm:$0xff] }
  0x11   :  { %334 = vmatpush.bf16.msra.mxu0 %v538_v17  ;;  %v544_v26 = vld [vmem:[#allocation5 + $0x60] sm:$0xff]  ;;  %v543_v30 = vld [vmem:[#allocation5 + $0x58] sm:$0xff]  ;;  %v542_v34 = vld [vmem:[#allocation5 + $0x50] sm:$0xff] }
  0x12   :  { %v53_v15 = vadd.f32 %v52_v14, %v50_v12  ;;  %347 = vmatpush.bf16.msra.mxu1 %v546_v18  ;;  %v552_v27 = vld [vmem:[#allocation5 + $0xa0] sm:$0xff]  ;;  %v551_v31 = vld [vmem:[#allocation5 + $0x98] sm:$0xff]  ;;  %v550_v35 = vld [vmem:[#allocation5 + $0x90] sm:$0xff] }
  0x13   :  { %360 = vmatpush.bf16.msra.mxu2 %v554_v19  ;;  %v560_v28 = vld [vmem:[#allocation5 + $0xe0] sm:$0xff]  ;;  %v559_v32 = vld [vmem:[#allocation5 + $0xd8] sm:$0xff]  ;;  %v558_v36 = vld [vmem:[#allocation5 + $0xd0] sm:$0xff] }
  0x14   :  { %v54_v16 = vadd.f32 %v53_v15, %v51_v13  ;;  %373 = vmatpush.bf16.msra.mxu3 %v562_v20  ;;  %v533_v37 = vld [vmem:[#allocation5 + $0x8] sm:$0xff]  ;;  %v532_v41 = vld [vmem:[#allocation5] sm:$0xff] }
  0x15   :  { %335 = vmatpush.bf16.msra.mxu0 %v537_v21  ;;  %v541_v38 = vld [vmem:[#allocation5 + $0x48] sm:$0xff]  ;;  %v540_v42 = vld [vmem:[#allocation5 + $0x40] sm:$0xff] }
  0x16   :  { %55 = vadd.xlane.f32.xlu0 %v54_v16  ;;  %348 = vmatpush.bf16.msra.mxu1 %v545_v22  ;;  %v549_v39 = vld [vmem:[#allocation5 + $0x88] sm:$0xff]  ;;  %v548_v43 = vld [vmem:[#allocation5 + $0x80] sm:$0xff] }
  0x17   :  { %361 = vmatpush.bf16.msra.mxu2 %v553_v23  ;;  %v557_v40 = vld [vmem:[#allocation5 + $0xc8] sm:$0xff]  ;;  %v556_v44 = vld [vmem:[#allocation5 + $0xc0] sm:$0xff] }
  0x18   :  { %374 = vmatpush.bf16.msra.mxu3 %v561_v24 }
  0x19   :  { %336 = vmatpush.bf16.msra.mxu0 %v536_v25 }
  0x1a   :  { %349 = vmatpush.bf16.msra.mxu1 %v544_v26 }
  0x1b   :  { %362 = vmatpush.bf16.msra.mxu2 %v552_v27 }
  0x1c   :  { %375 = vmatpush.bf16.msra.mxu3 %v560_v28 }
  0x1d   :  { %337 = vmatpush.bf16.msra.mxu0 %v535_v29 }
  0x1e   :  { %350 = vmatpush.bf16.msra.mxu1 %v543_v30 }
  0x1f   :  { %363 = vmatpush.bf16.msra.mxu2 %v551_v31 }
  0x20   :  { %376 = vmatpush.bf16.msra.mxu3 %v559_v32 }
  0x21   :  { %338 = vmatpush.bf16.msra.mxu0 %v534_v33 }
  0x22   :  { %351 = vmatpush.bf16.msra.mxu1 %v542_v34 }
  0x23   :  { %364 = vmatpush.bf16.msra.mxu2 %v550_v35 }
  0x24   :  { %377 = vmatpush.bf16.msra.mxu3 %v558_v36 }
  0x25   :  { %339 = vmatpush.bf16.msra.mxu0 %v533_v37 }
  0x26   :  { %352 = vmatpush.bf16.msra.mxu1 %v541_v38 }
  0x27   :  { %365 = vmatpush.bf16.msra.mxu2 %v549_v39 }
  0x28   :  { %378 = vmatpush.bf16.msra.mxu3 %v557_v40 }
  0x29   :  { %340 = vmatpush.bf16.msra.mxu0 %v532_v41 }
  0x2a   :  { %353 = vmatpush.bf16.msra.mxu1 %v540_v42 }
  0x2b   :  { %366 = vmatpush.bf16.msra.mxu2 %v548_v43 }
  0x2c   :  { %379 = vmatpush.bf16.msra.mxu3 %v556_v44 }
  0x89   :  { %v56_v45 = vpop.xlane.xlu0 %55 }
  0x8a   :  { %v57_v46 = vmax.f32 %v56_v45, 1e-12 }
  0x8c   :  { %569 = vrsqrt.f32 %v57_v46  ;;  %vm64_vm1 = vweird.f32 %v57_v46 }
  0x92   :  { %v570_v47 = vpop.eup %569 }
  0x93   :  { %v59_v48 = vmul.f32 %v570_v47, %v57_v46  ;;  %vm65_vm0 = vweird.f32 %v570_v47 }
  0x94   :  { %vm66_vm2 = vmor %vm64_vm1, %vm65_vm0 }
  0x95   :  { %v60_v49 = vmul.f32 %v570_v47, %v59_v48 }
  0x97   :  { %v61_v50 = vmul.f32 0.5, %v60_v49 }
  0x99   :  { %v62_v51 = vsub.f32 1.5, %v61_v50 }
  0x9b   :  { %v63_v52 = vmul.f32 %v570_v47, %v62_v51 }
  0x9d   :  { %v67_v53 = vsel %vm66_vm2, %v570_v47, %v63_v52 }
  0x9e   :  { %v68_v54 = vmul.f32 100.0, %v67_v53 }
  0xa0   :  { %v69_v55 = vmul.f32 %v68_v54, %v675_v3  ;;  %v70_v56 = vmul.f32 %v68_v54, %v677_v4  ;;  %v71_v57 = vmul.f32 %v68_v54, %v679_v5  ;;  %v72_v58 = vmul.f32 %v68_v54, %v681_v6 }
  0xa2   :  { %v73_v59 = vpack.c.bf16 %v69_v55, %v69_v55  ;;  %v74_v60 = vpack.c.bf16 %v70_v56, %v70_v56  ;;  %v75_v61 = vpack.c.bf16 %v71_v57, %v71_v57  ;;  %v76_v62 = vpack.c.bf16 %v72_v58, %v72_v58 }
  0xa4   :  { %341 = vmatmul.bf16.vlgmr.msra.gmra.mxu0 %v73_v59  ;;  %354 = vmatmul.bf16.vlgmr.msra.gmra.mxu1 %v74_v60 }
  0xa5   :  { %367 = vmatmul.bf16.vlgmr.msra.gmra.mxu2 %v75_v61  ;;  %380 = vmatmul.bf16.vlgmr.msra.gmra.mxu3 %v76_v62 }
 0x121   :  { %v342_v63 = vpop.f32.mrf.mxu0  ;;  %v355_v0 = vpop.f32.mrf.mxu1 }
 0x122   :  { %v356_v1 = vadd.f32 %v355_v0, %v342_v63 }
 0x128   :  { %v368_v2 = vpop.f32.mrf.mxu2  ;;  %v381_v7 = vpop.f32.mrf.mxu3 }
 0x129   :  { %v369_v3 = vadd.f32 %v368_v2, %v356_v1  ;;  %v344_v4 = vpop.f32.mrf.mxu0  ;;  %v357_v5 = vpop.f32.mrf.mxu1 }
 0x12b   :  { %v382_v6 = vadd.f32 %v381_v7, %v369_v3 }
 0x12d   :  { %385 = vst [vmem:[#allocation7] sm:$0xff] %v382_v6 }
 0x12e   :  { %396 = dma.vmem_to_hbm [thread:$0]  %s392_s1, 128, %s394_s23, [#allocation4]  }
 0x130   :  { %v370_v8 = vpop.f32.mrf.mxu2  ;;  %v383_v9 = vpop.f32.mrf.mxu3 }
 0x131   :  { %647 = dma.done.wait [#allocation4], 128  }
 0x132   :  { %648 = vsyncadd [#allocation4], 4294967168 }
 0x133   :  { %401 = vsyncpa [#allocation3], 1 }
 0x134   :  { %402 = vsyncpa [#allocation6], 1 }
 0x135   :  { %403 = vsyncpa [#allocation4], 1 }

</bundles_post_ra>
